<compile_context>
chip_gen: v7x
topology: tpu7x:2x2x1
jax: 0.10.0
libtpu: 0.0.40
codegen_flags: <defaults>
</compile_context>

<pallas_src>
import functools

import jax
import jax.numpy as jnp
from jax import lax
from jax.experimental import pallas as pl
from jax.experimental.pallas import tpu as pltpu
import numpy as np

# ----------------------------- config -----------------------------
B = 2        # batch
C = 32       # acoustic feature channels ("hidden")
T = 16       # time frames
S = 8        # decoder sequence length so far
V = 256      # vocab size (n_cls)
EOS_TOKEN_ID = 2
N_GEN_STEPS = 4   # steps fused into one launch for the generate-style demo


# ----------------------------- kernel -----------------------------
def bayes_ensemble_kernel(last_tok_ref,   # VMEM (B, 1)  int32 — initial last token
                          pooled_ref,     # VMEM (B, C)  f32
                          wcat_ref,       # VMEM (C, 2V) f32   = [w1 | w2]
                          bcat_ref,       # VMEM (1, 2V) f32   = [b1 | b2]
                          emb1_ref,       # VMEM (V, C)  f32
                          emb2_ref,       # VMEM (V, C)  f32
                          picat_ref,      # VMEM (2V, V) f32   = [pi1 ; pi2]
                          preds_ref,      # VMEM out (B, 1) int32   (step block)
                          post_ref,       # VMEM out (B, V) f32     (step block)
                          last_onehot):   # VMEM scratch (B, V) f32 — carried across steps
    s = pl.program_id(0)
    b_sz, _ = pooled_ref.shape
    v = emb1_ref.shape[0]

    iota_bv = lax.broadcasted_iota(jnp.int32, (b_sz, v), 1)

    # step 0: seed the carried one-hot from the caller-provided last token
    @pl.when(s == 0)
    def _():
        last_onehot[...] = (iota_bv == last_tok_ref[...]).astype(jnp.float32)

    # ---- 1) last-token embedding rows via exact one-hot MXU gathers ----
    oh = last_onehot[...]                                              # (B, V)
    e1 = jnp.dot(oh, emb1_ref[...], preferred_element_type=jnp.float32)   # (B, C)
    e2 = jnp.dot(oh, emb2_ref[...], preferred_element_type=jnp.float32)   # (B, C)

    # ---- 2) both synthetic heads fused into a single MXU matmul ----
    pooled = pooled_ref[...]                                           # (B, C)
    x = jnp.concatenate([pooled + e1, pooled + e2], axis=0)            # (2B, C)
    logits = jnp.dot(x, wcat_ref[...],
                     preferred_element_type=jnp.float32) + bcat_ref[...]   # (2B, 2V)

    # ---- 3) per-head argmax on the fused logits (softmax removed) ----
    # rows 0:B  -> head 1, valid lanes [0, V)
    # rows B:2B -> head 2, valid lanes [V, 2V)
    row = lax.broadcasted_iota(jnp.int32, (2 * b_sz, 2 * v), 0)
    col = lax.broadcasted_iota(jnp.int32, (2 * b_sz, 2 * v), 1)
    valid = (row < b_sz) == (col < v)
    masked = jnp.where(valid, logits, jnp.finfo(jnp.float32).min)
    m = jnp.max(masked, axis=-1, keepdims=True)
    cand = jnp.where(masked == m, col, jnp.int32(2 * v))
    pred_full = jnp.min(cand, axis=-1, keepdims=True)                  # (2B, 1)

    # ---- 4) confusion-row gather: one-hot @ [pi1 ; pi2] (exact) ----
    onehot_full = (col == pred_full).astype(jnp.float32)               # (2B, 2V)
    rows_cat = jnp.dot(onehot_full, picat_ref[...],
                       preferred_element_type=jnp.float32)             # (2B, V)
    # rows 0:B  = pi1[pred1, :],  rows B:2B = pi2[pred2, :]

    # ---- 5) posterior: uniform prior & intermediate normalization cancel ----
    un = rows_cat[0:b_sz, :] * rows_cat[b_sz:2 * b_sz, :]              # (B, V)
    post_ref[...] = un / jnp.sum(un, axis=-1, keepdims=True)

    # ---- 6) combine == 'replace' -> emit head-2 prediction; carry its one-hot ----
    pred2 = pred_full[b_sz:2 * b_sz, :] - v                            # (B, 1)
    preds_ref[...] = pred2
    last_onehot[...] = (iota_bv == pred2).astype(jnp.float32)


# ----------------------------- wrapper -----------------------------
def prepare_kernel_params(params):
    """One-time weight-layout prep (done once, off the decode hot path)."""
    return {
        "wcat":  jnp.concatenate([params["w1"], params["w2"]], axis=1),    # (C, 2V)
        "bcat":  jnp.concatenate([params["b1"], params["b2"]], axis=1),    # (1, 2V)
        "picat": jnp.concatenate([params["pi1"], params["pi2"]], axis=0),  # (2V, V)
        "emb1":  params["emb1"],
        "emb2":  params["emb2"],
    }


@functools.partial(jax.jit, static_argnames=("n_steps", "eos_token_id"))
def bayesian_ensemble_decode(input_features, attention_mask, decoder_input_ids,
                             kparams, n_steps=1, eos_token_id=EOS_TOKEN_ID):
    del attention_mask  # synthetic heads don't use it (real models would)
    batch, n_ch = input_features.shape[0], input_features.shape[1]
    vocab = kparams["emb1"].shape[0]

    # hoisted out of the kernel: mean-pool over T (tiny; XLA fuses it)
    pooled = jnp.mean(input_features, axis=-1)               # (B, C)
    last_tok0 = decoder_input_ids[:, -1:].astype(jnp.int32)  # (B, 1)

    def const_map(ndim):
        return lambda s: (0,) * ndim

    in_specs = [
        pl.BlockSpec((batch, 1), const_map(2)),           # last_tok0
        pl.BlockSpec((batch, n_ch), const_map(2)),        # pooled
        pl.BlockSpec((n_ch, 2 * vocab), const_map(2)),    # wcat   (VMEM-resident)
        pl.BlockSpec((1, 2 * vocab), const_map(2)),       # bcat
        pl.BlockSpec((vocab, n_ch), const_map(2)),        # emb1
        pl.BlockSpec((vocab, n_ch), const_map(2)),        # emb2
        pl.BlockSpec((2 * vocab, vocab), const_map(2)),   # picat
    ]
    out_specs = (
        pl.BlockSpec((None, batch, 1), lambda s: (s, 0, 0)),      # preds per step
        pl.BlockSpec((None, batch, vocab), lambda s: (s, 0, 0)),  # posterior per step
    )
    out_shape = (
        jax.ShapeDtypeStruct((n_steps, batch, 1), jnp.int32),
        jax.ShapeDtypeStruct((n_steps, batch, vocab), jnp.float32),
    )

    # advisory cost hint for XLA's scheduler
    flops = 2 * n_steps * (2 * batch * vocab * n_ch          # emb one-hot gathers
                           + 2 * batch * n_ch * 2 * vocab    # fused heads
                           + 2 * batch * 2 * vocab * vocab)  # pi one-hot gather
    const_bytes = 4 * (batch + batch * n_ch + n_ch * 2 * vocab + 2 * vocab
                       + 2 * vocab * n_ch + 2 * vocab * vocab)
    out_bytes = 4 * n_steps * (batch + batch * vocab)

    preds, posts = pl.pallas_call(
        bayes_ensemble_kernel,
        grid=(n_steps,),
        in_specs=in_specs,
        out_specs=out_specs,
        out_shape=out_shape,
        scratch_shapes=[pltpu.VMEM((batch, vocab), jnp.float32)],   # carried one-hot
        compiler_params=pltpu.CompilerParams(
            dimension_semantics=("arbitrary",)),                    # steps are sequential
        cost_estimate=pl.CostEstimate(flops=int(flops), transcendentals=0,
                                      bytes_accessed=int(const_bytes + out_bytes)),
    )(last_tok0, pooled, kparams["wcat"], kparams["bcat"],
      kparams["emb1"], kparams["emb2"], kparams["picat"])

    new_tokens = jnp.transpose(preds[:, :, 0])                # (B, n_steps)
    new_ids = jnp.concatenate([decoder_input_ids, new_tokens], axis=-1)

    # glue: count finished sequences (count_seq_end) on the final ids
    eos_count = jnp.sum(new_ids == eos_token_id, axis=1)
    is_terminate = jnp.sum(eos_count >= 2) == batch
    return new_ids, is_terminate, posts


def bayesian_ensemble_forward(input_features, attention_mask, decoder_input_ids,
                              kparams, eos_token_id=EOS_TOKEN_ID):
    """Exactly the module's forward(): append one token + termination flag."""
    new_ids, is_terminate, posts = bayesian_ensemble_decode(
        input_features, attention_mask, decoder_input_ids, kparams,
        n_steps=1, eos_token_id=eos_token_id)
    return new_ids, is_terminate, posts[0]


# ------------------- reference (pure JAX, mirrors the module) -------------------
def reference_forward(input_features, decoder_input_ids, params):
    pooled = jnp.mean(input_features, axis=-1)
    last = decoder_input_ids[:, -1].astype(jnp.int32)
    x1 = pooled + params["emb1"][last]
    x2 = pooled + params["emb2"][last]
    l1 = x1 @ params["w1"] + params["b1"]
    l2 = x2 @ params["w2"] + params["b2"]
    p1 = jax.nn.softmax(l1, axis=-1)
    p2 = jax.nn.softmax(l2, axis=-1)
    pred1 = jnp.argmax(p1, axis=-1)
    pred2 = jnp.argmax(p2, axis=-1)
    n_cls = params["w1"].shape[1]
    prior = jnp.full((pooled.shape[0], n_cls), 1.0 / n_cls)
    un1 = params["pi1"][pred1] * prior
    post1 = un1 / jnp.sum(un1, axis=-1, keepdims=True)
    un2 = params["pi2"][pred2] * post1
    post2 = un2 / jnp.sum(un2, axis=-1, keepdims=True)
    return pred2, post2


# ----------------------------- main -----------------------------
if __name__ == "__main__":
    key = jax.random.PRNGKey(0)
    ks = jax.random.split(key, 12)

    params = {
        "emb1": jax.random.normal(ks[0], (V, C), jnp.float32) * 0.1,
        "emb2": jax.random.normal(ks[1], (V, C), jnp.float32) * 0.1,
        "w1":   jax.random.normal(ks[2], (C, V), jnp.float32) * 0.2,
        "w2":   jax.random.normal(ks[3], (C, V), jnp.float32) * 0.2,
        "b1":   jax.random.normal(ks[4], (1, V), jnp.float32) * 0.05,
        "b2":   jax.random.normal(ks[5], (1, V), jnp.float32) * 0.05,
        # confusion-like matrices: strictly positive (required for the
        # prior/normalization cancellation)
        "pi1":  jax.random.uniform(ks[6], (V, V), jnp.float32, 0.01, 1.0),
        "pi2":  jax.random.uniform(ks[7], (V, V), jnp.float32, 0.01, 1.0),
    }
    kparams = prepare_kernel_params(params)   # weight-layout prep, done once

    input_features = jax.random.normal(ks[8], (B, C, T), jnp.float32)   # NCW
    attention_mask = jnp.ones((B, T), jnp.int32)
    decoder_input_ids = jax.random.randint(ks[9], (B, S), 0, V, jnp.int32)

    # ---- single-step forward (module.forward semantics) ----
    new_ids, is_terminate, posterior = bayesian_ensemble_forward(
        input_features, attention_mask, decoder_input_ids, kparams)
    jax.block_until_ready((new_ids, is_terminate, posterior))

    ref_pred, ref_post = reference_forward(input_features, decoder_input_ids, params)
    np.testing.assert_array_equal(np.asarray(new_ids[:, -1]), np.asarray(ref_pred))
    np.testing.assert_allclose(np.asarray(posterior), np.asarray(ref_post),
                               rtol=1e-5, atol=1e-6)

    # ---- fused multi-step decode (one launch, weights VMEM-resident) ----
    ids_multi, term_multi, posts_multi = bayesian_ensemble_decode(
        input_features, attention_mask, decoder_input_ids, kparams,
        n_steps=N_GEN_STEPS)
    jax.block_until_ready((ids_multi, term_multi, posts_multi))

    ids_ref = decoder_input_ids
    for step in range(N_GEN_STEPS):
        p_ref, post_ref_s = reference_forward(input_features, ids_ref, params)
        np.testing.assert_array_equal(np.asarray(ids_multi[:, S + step]),
                                      np.asarray(p_ref))
        np.testing.assert_allclose(np.asarray(posts_multi[step]),
                                   np.asarray(post_ref_s), rtol=1e-5, atol=1e-6)
        ids_ref = jnp.concatenate([ids_ref, p_ref[:, None].astype(jnp.int32)],
                                  axis=-1)
    np.testing.assert_array_equal(np.asarray(ids_multi), np.asarray(ids_ref))

    print("KERNEL_OK")
</pallas_src>

<mosaic_0001>
module attributes {stable_mosaic.version = 11 : i64} {
  func.func @bayes_ensemble_kernel(%arg0: i32, %arg1: memref<2x1xi32, #tpu.memory_space<vmem>>, %arg2: memref<2x32xf32, #tpu.memory_space<vmem>>, %arg3: memref<32x512xf32, #tpu.memory_space<vmem>>, %arg4: memref<1x512xf32, #tpu.memory_space<vmem>>, %arg5: memref<256x32xf32, #tpu.memory_space<vmem>>, %arg6: memref<256x32xf32, #tpu.memory_space<vmem>>, %arg7: memref<512x256xf32, #tpu.memory_space<vmem>>, %arg8: memref<1x2x1xi32, #tpu.memory_space<vmem>>, %arg9: memref<1x2x256xf32, #tpu.memory_space<vmem>>, %arg10: memref<2x256xf32, #tpu.memory_space<vmem>>) attributes {dimension_semantics = [#tpu.dimension_semantics<arbitrary>], iteration_bounds = array<i64: 1>, scalar_prefetch = 0 : i64, scratch_operands = 1 : i64, tpu.core_type = #tpu.core_type<tc>, window_params = [{pipeline_mode = #tpu.pipeline_mode<synchronous>, transform_indices = @transform_0, window_bounds = array<i64: 2, 1>}, {pipeline_mode = #tpu.pipeline_mode<synchronous>, transform_indices = @transform_1, window_bounds = array<i64: 2, 32>}, {pipeline_mode = #tpu.pipeline_mode<synchronous>, transform_indices = @transform_2, window_bounds = array<i64: 32, 512>}, {pipeline_mode = #tpu.pipeline_mode<synchronous>, transform_indices = @transform_3, window_bounds = array<i64: 1, 512>}, {pipeline_mode = #tpu.pipeline_mode<synchronous>, transform_indices = @transform_4, window_bounds = array<i64: 256, 32>}, {pipeline_mode = #tpu.pipeline_mode<synchronous>, transform_indices = @transform_5, window_bounds = array<i64: 256, 32>}, {pipeline_mode = #tpu.pipeline_mode<synchronous>, transform_indices = @transform_6, window_bounds = array<i64: 512, 256>}, {transform_indices = @transform_7, window_bounds = array<i64: 1, 2, 1>}, {transform_indices = @transform_8, window_bounds = array<i64: 1, 2, 256>}]} {
    %0 = tpu.iota {dimensions = array<i32: 1>} : vector<2x256xi32>
    %c0_i32 = arith.constant 0 : i32
    %1 = arith.cmpi eq, %arg0, %c0_i32 : i32
    %2 = arith.extui %1 : i1 to i32
    %c0_i32_0 = arith.constant 0 : i32
    %3 = arith.cmpi ne, %2, %c0_i32_0 : i32
    scf.if %3 {
      %c0_31 = arith.constant 0 : index
      %c0_32 = arith.constant 0 : index
      %63 = vector.load %arg1[%c0_31, %c0_32] : memref<2x1xi32, #tpu.memory_space<vmem>>, vector<2x1xi32>
      %64 = vector.broadcast %63 : vector<2x1xi32> to vector<2x256xi32>
      %65 = arith.cmpi eq, %0, %64 : vector<2x256xi32>
      %66 = arith.extui %65 : vector<2x256xi1> to vector<2x256xi32>
      %67 = arith.sitofp %66 : vector<2x256xi32> to vector<2x256xf32>
      %c0_33 = arith.constant 0 : index
      %c0_34 = arith.constant 0 : index
      %68 = vector.load %arg10[%c0_33, %c0_34] : memref<2x256xf32, #tpu.memory_space<vmem>>, vector<2x256xf32>
      tpu.vector_store %arg10[%c0_33, %c0_34], %67 {strides = array<i32>} : memref<2x256xf32, #tpu.memory_space<vmem>>, vector<2x256xf32>,
    } else {
    }
    %c0 = arith.constant 0 : index
    %c0_1 = arith.constant 0 : index
    %4 = vector.load %arg10[%c0, %c0_1] : memref<2x256xf32, #tpu.memory_space<vmem>>, vector<2x256xf32>
    %c0_2 = arith.constant 0 : index
    %c0_3 = arith.constant 0 : index
    %5 = vector.load %arg5[%c0_2, %c0_3] : memref<256x32xf32, #tpu.memory_space<vmem>>, vector<256x32xf32>
    %cst = arith.constant dense<0.000000e+00> : vector<2x32xf32>
    %6 = tpu.matmul %4, %5, %cst {dimension_numbers = #tpu.dot_dimension_numbers<[1], [0], [0], [1], [0, 0, 1, 1], [], []>} : vector<2x256xf32>, vector<256x32xf32>, vector<2x32xf32> -> vector<2x32xf32>
    %c0_4 = arith.constant 0 : index
    %c0_5 = arith.constant 0 : index
    %7 = vector.load %arg6[%c0_4, %c0_5] : memref<256x32xf32, #tpu.memory_space<vmem>>, vector<256x32xf32>
    %cst_6 = arith.constant dense<0.000000e+00> : vector<2x32xf32>
    %8 = tpu.matmul %4, %7, %cst_6 {dimension_numbers = #tpu.dot_dimension_numbers<[1], [0], [0], [1], [0, 0, 1, 1], [], []>} : vector<2x256xf32>, vector<256x32xf32>, vector<2x32xf32> -> vector<2x32xf32>
    %c0_7 = arith.constant 0 : index
    %c0_8 = arith.constant 0 : index
    %9 = vector.load %arg2[%c0_7, %c0_8] : memref<2x32xf32, #tpu.memory_space<vmem>>, vector<2x32xf32>
    %10 = arith.addf %9, %6 : vector<2x32xf32>
    %11 = arith.addf %9, %8 : vector<2x32xf32>
    %12 = tpu.concatenate %10, %11 in 0 : vector<2x32xf32>, vector<2x32xf32> -> vector<4x32xf32>
    %c0_9 = arith.constant 0 : index
    %c0_10 = arith.constant 0 : index
    %13 = vector.load %arg3[%c0_9, %c0_10] : memref<32x512xf32, #tpu.memory_space<vmem>>, vector<32x512xf32>
    %cst_11 = arith.constant dense<0.000000e+00> : vector<4x512xf32>
    %14 = tpu.matmul %12, %13, %cst_11 {dimension_numbers = #tpu.dot_dimension_numbers<[1], [0], [0], [1], [0, 0, 1, 1], [], []>} : vector<4x32xf32>, vector<32x512xf32>, vector<4x512xf32> -> vector<4x512xf32>
    %c0_12 = arith.constant 0 : index
    %c0_13 = arith.constant 0 : index
    %15 = vector.load %arg4[%c0_12, %c0_13] : memref<1x512xf32, #tpu.memory_space<vmem>>, vector<1x512xf32>
    %16 = vector.broadcast %15 : vector<1x512xf32> to vector<4x512xf32>
    %17 = arith.addf %14, %16 : vector<4x512xf32>
    %18 = tpu.iota {dimensions = array<i32: 0>} : vector<4x512xi32>
    %19 = tpu.iota {dimensions = array<i32: 1>} : vector<4x512xi32>
    %c2_i32 = arith.constant 2 : i32
    %20 = vector.broadcast %c2_i32 : i32 to vector<4x512xi32>
    %21 = arith.cmpi slt, %18, %20 : vector<4x512xi32>
    %c256_i32 = arith.constant 256 : i32
    %22 = vector.broadcast %c256_i32 : i32 to vector<4x512xi32>
    %23 = arith.cmpi slt, %19, %22 : vector<4x512xi32>
    %24 = arith.xori %21, %23 : vector<4x512xi1>
    %cst_14 = arith.constant dense<true> : vector<4x512xi1>
    %25 = arith.xori %24, %cst_14 : vector<4x512xi1>
    %cst_15 = arith.constant -3.40282347E+38 : f32
    %26 = vector.broadcast %cst_15 : f32 to vector<4x512xf32>
    %27 = arith.select %25, %17, %26 : vector<4x512xi1>, vector<4x512xf32>
    %cst_16 = arith.constant dense<0xFF800000> : vector<4xf32>
    %28 = vector.multi_reduction <maximumf>, %27, %cst_16 [1] : vector<4x512xf32> to vector<4xf32>
    %29 = vector.shape_cast %28 : vector<4xf32> to vector<4x1xf32>
    %30 = vector.broadcast %29 : vector<4x1xf32> to vector<4x512xf32>
    %31 = arith.cmpf oeq, %27, %30 : vector<4x512xf32>
    %c512_i32 = arith.constant 512 : i32
    %32 = vector.broadcast %c512_i32 : i32 to vector<4x512xi32>
    %33 = arith.select %31, %19, %32 : vector<4x512xi1>, vector<4x512xi32>
    %cst_17 = arith.constant dense<2147483647> : vector<4xi32>
    %34 = vector.multi_reduction <minsi>, %33, %cst_17 [1] : vector<4x512xi32> to vector<4xi32>
    %35 = vector.shape_cast %34 : vector<4xi32> to vector<4x1xi32>
    %36 = vector.broadcast %35 : vector<4x1xi32> to vector<4x512xi32>
    %37 = arith.cmpi eq, %19, %36 : vector<4x512xi32>
    %38 = arith.extui %37 : vector<4x512xi1> to vector<4x512xi32>
    %39 = arith.sitofp %38 : vector<4x512xi32> to vector<4x512xf32>
    %c0_18 = arith.constant 0 : index
    %c0_19 = arith.constant 0 : index
    %40 = vector.load %arg7[%c0_18, %c0_19] : memref<512x256xf32, #tpu.memory_space<vmem>>, vector<512x256xf32>
    %cst_20 = arith.constant dense<0.000000e+00> : vector<4x256xf32>
    %41 = tpu.matmul %39, %40, %cst_20 {dimension_numbers = #tpu.dot_dimension_numbers<[1], [0], [0], [1], [0, 0, 1, 1], [], []>} : vector<4x512xf32>, vector<512x256xf32>, vector<4x256xf32> -> vector<4x256xf32>
    %42 = vector.extract_strided_slice %41 {offsets = [0, 0], sizes = [2, 256], strides = [1, 1]} : vector<4x256xf32> to vector<2x256xf32>
    %43 = vector.extract_strided_slice %41 {offsets = [2, 0], sizes = [2, 256], strides = [1, 1]} : vector<4x256xf32> to vector<2x256xf32>
    %44 = arith.mulf %42, %43 : vector<2x256xf32>
    %cst_21 = arith.constant dense<0.000000e+00> : vector<2xf32>
    %45 = vector.multi_reduction <add>, %44, %cst_21 [1] : vector<2x256xf32> to vector<2xf32>
    %46 = vector.shape_cast %45 : vector<2xf32> to vector<2x1xf32>
    %47 = vector.broadcast %46 : vector<2x1xf32> to vector<2x256xf32>
    %48 = arith.divf %44, %47 : vector<2x256xf32>
    %c0_22 = arith.constant 0 : index
    %c0_23 = arith.constant 0 : index
    %c0_24 = arith.constant 0 : index
    %49 = vector.load %arg9[%c0_22, %c0_23, %c0_24] : memref<1x2x256xf32, #tpu.memory_space<vmem>>, vector<1x2x256xf32>
    %50 = vector.shape_cast %49 : vector<1x2x256xf32> to vector<2x256xf32>
    %51 = vector.shape_cast %48 : vector<2x256xf32> to vector<1x2x256xf32>
    tpu.vector_store %arg9[%c0_22, %c0_23, %c0_24], %51 {strides = array<i32>} : memref<1x2x256xf32, #tpu.memory_space<vmem>>, vector<1x2x256xf32>,
    %52 = vector.extract_strided_slice %35 {offsets = [2, 0], sizes = [2, 1], strides = [1, 1]} : vector<4x1xi32> to vector<2x1xi32>
    %c256_i32_25 = arith.constant 256 : i32
    %53 = vector.broadcast %c256_i32_25 : i32 to vector<2x1xi32>
    %54 = arith.subi %52, %53 : vector<2x1xi32>
    %c0_26 = arith.constant 0 : index
    %c0_27 = arith.constant 0 : index
    %c0_28 = arith.constant 0 : index
    %55 = vector.load %arg8[%c0_26, %c0_27, %c0_28] : memref<1x2x1xi32, #tpu.memory_space<vmem>>, vector<1x2x1xi32>
    %56 = vector.shape_cast %55 : vector<1x2x1xi32> to vector<2x1xi32>
    %57 = vector.shape_cast %54 : vector<2x1xi32> to vector<1x2x1xi32>
    tpu.vector_store %arg8[%c0_26, %c0_27, %c0_28], %57 {strides = array<i32>} : memref<1x2x1xi32, #tpu.memory_space<vmem>>, vector<1x2x1xi32>,
    %58 = vector.broadcast %54 : vector<2x1xi32> to vector<2x256xi32>
    %59 = arith.cmpi eq, %0, %58 : vector<2x256xi32>
    %60 = arith.extui %59 : vector<2x256xi1> to vector<2x256xi32>
    %61 = arith.sitofp %60 : vector<2x256xi32> to vector<2x256xf32>
    %c0_29 = arith.constant 0 : index
    %c0_30 = arith.constant 0 : index
    %62 = vector.load %arg10[%c0_29, %c0_30] : memref<2x256xf32, #tpu.memory_space<vmem>>, vector<2x256xf32>
    tpu.vector_store %arg10[%c0_29, %c0_30], %61 {strides = array<i32>} : memref<2x256xf32, #tpu.memory_space<vmem>>, vector<2x256xf32>,
    return
  }
  func.func @transform_0(%arg0: i32) -> (i32, i32) {
    %c0_i32 = arith.constant 0 : i32
    %c0_i32_0 = arith.constant 0 : i32
    %c0_i32_1 = arith.constant 0 : i32
    return %c0_i32, %c0_i32_0 : i32, i32
  }
  func.func @transform_1(%arg0: i32) -> (i32, i32) {
    %c0_i32 = arith.constant 0 : i32
    %c0_i32_0 = arith.constant 0 : i32
    %c0_i32_1 = arith.constant 0 : i32
    return %c0_i32, %c0_i32_0 : i32, i32
  }
  func.func @transform_2(%arg0: i32) -> (i32, i32) {
    %c0_i32 = arith.constant 0 : i32
    %c0_i32_0 = arith.constant 0 : i32
    %c0_i32_1 = arith.constant 0 : i32
    return %c0_i32, %c0_i32_0 : i32, i32
  }
  func.func @transform_3(%arg0: i32) -> (i32, i32) {
    %c0_i32 = arith.constant 0 : i32
    %c0_i32_0 = arith.constant 0 : i32
    %c0_i32_1 = arith.constant 0 : i32
    return %c0_i32, %c0_i32_0 : i32, i32
  }
  func.func @transform_4(%arg0: i32) -> (i32, i32) {
    %c0_i32 = arith.constant 0 : i32
    %c0_i32_0 = arith.constant 0 : i32
    %c0_i32_1 = arith.constant 0 : i32
    return %c0_i32, %c0_i32_0 : i32, i32
  }
  func.func @transform_5(%arg0: i32) -> (i32, i32) {
    %c0_i32 = arith.constant 0 : i32
    %c0_i32_0 = arith.constant 0 : i32
    %c0_i32_1 = arith.constant 0 : i32
    return %c0_i32, %c0_i32_0 : i32, i32
  }
  func.func @transform_6(%arg0: i32) -> (i32, i32) {
    %c0_i32 = arith.constant 0 : i32
    %c0_i32_0 = arith.constant 0 : i32
    %c0_i32_1 = arith.constant 0 : i32
    return %c0_i32, %c0_i32_0 : i32, i32
  }
  func.func @transform_7(%arg0: i32) -> (i32, i32, i32) {
    %c0_i32 = arith.constant 0 : i32
    %c0_i32_0 = arith.constant 0 : i32
    %c0_i32_1 = arith.constant 0 : i32
    return %arg0, %c0_i32, %c0_i32_0 : i32, i32, i32
  }
  func.func @transform_8(%arg0: i32) -> (i32, i32, i32) {
    %c0_i32 = arith.constant 0 : i32
    %c0_i32_0 = arith.constant 0 : i32
    %c0_i32_1 = arith.constant 0 : i32
    return %arg0, %c0_i32, %c0_i32_0 : i32, i32, i32
  }
}

</mosaic_0001>

<bundles_post_ra>
// kernel: bayesian_ensemble_decode.1
= control target key start
LH: loop header
LB: loop body
LE: loop exit
PB: predicated region body
PF: predicated region fallthrough
CT: control target
= control target key end

     0   :  { %14 = vsyncpa [#allocation4], 0  ;;  %s1650_s0 = inlined_call_operand.vmem [shape: s32[2,1], index: 0, kind: input, shape index: {}]   ;;  %s1651_s1 = inlined_call_operand.vmem [shape: f32[2,32], index: 1, kind: input, shape index: {}]   ;;  %s1652_s2 = inlined_call_operand.vmem [shape: f32[32,512], index: 2, kind: input, shape index: {}]   ;;  %s1653_s3 = inlined_call_operand.vmem [shape: f32[1,512], index: 3, kind: input, shape index: {}]   ;;  %s1654_s4 = inlined_call_operand.vmem [shape: f32[256,32], index: 4, kind: input, shape index: {}]   ;;  %s1655_s5 = inlined_call_operand.vmem [shape: f32[256,32], index: 5, kind: input, shape index: {}]   ;;  %s1656_s6 = inlined_call_operand.hbm [shape: f32[512,256], index: 6, kind: input, shape index: {}]   ;;  %s1657_s7 = inlined_call_operand.vmem [shape: s32[1,2,1], index: 7, kind: output, shape index: {0}]   ;;  %s1658_s8 = inlined_call_operand.hbm [shape: f32[1,2,256], index: 8, kind: output, shape index: {1}]  }
   0x1   :  { %15 = vsyncpa [#allocation5], 0  ;;  %s1252_s27 = smov [#allocation3]   ;;  %s1204_s9 = scalar_lea.hbm %s1656_s6, 16384 }
   0x2   :  { %s33_s28 = sshll.u32 %s1252_s27, 4  ;;  %p1205_p0 = scmp.ne.s32.totalorder %s1656_s6, %s1204_s9  ;;  %s34_s28 = int_to_ptr.vmem [resolvable:$true] %s33_s28 }
   0x3   :  { %p1208_p1 = scmp.lt.u32.totalorder %s1204_s9, %s1656_s6 }
   0x5   :  { %p1210_p2 = pnand %p1208_p1, %p1205_p0 }
   0x7   :  { %1213 = shalt.err (!%p1210_p2)
}
   0x8   :  { %s1214_s14 = scalar_lea.vmem %s34_s28, 16384  ;;  %p1219_p4 = scmp.lt.s32.totalorder %s34_s28, %s34_s28 }
   0x9   :  { %p1215_p3 = scmp.ne.s32.totalorder %s34_s28, %s1214_s14  ;;  %p1220_p5 = scmp.lt.s32.totalorder %s1214_s14, %s1214_s14 }
   0xb   :  { %p1221_p6 = por %p1220_p5, %p1219_p4 }
   0xd   :  { %p1222_p7 = pnand %p1221_p6, %p1215_p3 }
   0xf   :  { %1225 = shalt.err (!%p1222_p7)
}
  0x10   :  { %s1253_s15 = smov 256   ;;  %s1254_s16 = smov 16  }
  0x11   :  { %39 = dma.hbm_to_vmem [thread:$0]  %s1656_s6, 16384, %s34_s28, [#allocation4], %s1253_s15, %s1253_s15, %s1254_s16  }
  0x12   :  { %1248 = dma.done.wait [#allocation4], 16384  }
  0x13   :  { %1249 = vsyncadd [#allocation4], 4294950912  ;;  %v1255_v0 = vmov 0   ;;  %v50_v1 = vld [vmem:[%s1650_s0] sm:$0x3]  ;;  %v90_v3 = vld [vmem:[%s1654_s4 + $0x88] sm:$0xff] }
  0x14   :  { %1201 = vset.pattern.permute.xlu0 %v1255_v0  ;;  %v89_v2 = vld [vmem:[%s1654_s4 + $0x80] sm:$0xff]  ;;  %v203_v6 = vld [vmem:[%s1655_s5 + $0x88] sm:$0xff]  ;;  %v91_v14 = vld [vmem:[%s1654_s4 + $0x90] sm:$0xff]  ;;  %vm294_vm2 = vcmask 1041408   ;;  %vm334_vm3 = vcmask 261120   ;;  %vm1257_vm5 = vmmov 1  }
  0x15   :  { %52 = vperm.xlu0 %1201, %v50_v1   ;;  %v982_v4 = vpack.c.bf16 %v90_v3, %v89_v2  ;;  %v202_v5 = vld [vmem:[%s1655_s5 + $0x80] sm:$0xff]  ;;  %v74_v9 = vld [vmem:[%s1654_s4 + $0x8] sm:$0xff]  ;;  %v92_v15 = vld [vmem:[%s1654_s4 + $0x98] sm:$0xff]  ;;  %vm501_vm8 = vcmask 1043456  }
  0x16   :  { %v73_v7 = vld [vmem:[%s1654_s4] sm:$0xff]  ;;  %v1014_v8 = vpack.c.bf16 %v203_v6, %v202_v5  ;;  %v187_v11 = vld [vmem:[%s1655_s5 + $0x8] sm:$0xff]  ;;  %v204_v16 = vld [vmem:[%s1655_s5 + $0x90] sm:$0xff]  ;;  %v986_v17 = vpack.c.bf16 %v92_v15, %v91_v14 }
  0x17   :  { %v186_v10 = vld [vmem:[%s1655_s5] sm:$0xff]  ;;  %983 = vmatprep.subr.bf16.mxu0 %v982_v4  ;;  %v984_v12 = vpack.c.bf16 %v74_v9, %v73_v7  ;;  %v205_v18 = vld [vmem:[%s1655_s5 + $0x98] sm:$0xff]  ;;  %v75_v19 = vld [vmem:[%s1654_s4 + $0x10] sm:$0xff] }
  0x18   :  { %v1016_v13 = vpack.c.bf16 %v187_v11, %v186_v10  ;;  %1015 = vmatprep.subr.bf16.mxu1 %v1014_v8  ;;  %v76_v20 = vld [vmem:[%s1654_s4 + $0x18] sm:$0xff]  ;;  %v1018_v21 = vpack.c.bf16 %v205_v18, %v204_v16  ;;  %v188_v23 = vld [vmem:[%s1655_s5 + $0x10] sm:$0xff]  ;;  %v93_v25 = vld [vmem:[%s1654_s4 + $0xa0] sm:$0xff] }
  0x19   :  { %985 = vmatpush3.bf16.msra.mxu0 %v984_v12  ;;  %v988_v22 = vpack.c.bf16 %v76_v20, %v75_v19  ;;  %v189_v24 = vld [vmem:[%s1655_s5 + $0x18] sm:$0xff]  ;;  %v94_v27 = vld [vmem:[%s1654_s4 + $0xa8] sm:$0xff]  ;;  %v206_v28 = vld [vmem:[%s1655_s5 + $0xa0] sm:$0xff] }
  0x1a   :  { %1017 = vmatpush3.bf16.msra.mxu1 %v1016_v13  ;;  %987 = vmatprep.subr.bf16.mxu0 %v986_v17  ;;  %v1020_v26 = vpack.c.bf16 %v189_v24, %v188_v23  ;;  %v207_v29 = vld [vmem:[%s1655_s5 + $0xa8] sm:$0xff]  ;;  %v990_v30 = vpack.c.bf16 %v94_v27, %v93_v25  ;;  %v77_v32 = vld [vmem:[%s1654_s4 + $0x20] sm:$0xff]  ;;  %v95_v36 = vld [vmem:[%s1654_s4 + $0xb0] sm:$0xff] }
  0x1b   :  { %1019 = vmatprep.subr.bf16.mxu1 %v1018_v21  ;;  %v1022_v31 = vpack.c.bf16 %v207_v29, %v206_v28  ;;  %v78_v33 = vld [vmem:[%s1654_s4 + $0x28] sm:$0xff]  ;;  %v190_v34 = vld [vmem:[%s1655_s5 + $0x20] sm:$0xff]  ;;  %v96_v37 = vld [vmem:[%s1654_s4 + $0xb8] sm:$0xff] }
  0x1c   :  { %v191_v35 = vld [vmem:[%s1655_s5 + $0x28] sm:$0xff]  ;;  %v992_v38 = vpack.c.bf16 %v78_v33, %v77_v32  ;;  %v208_v40 = vld [vmem:[%s1655_s5 + $0xb0] sm:$0xff]  ;;  %v209_v41 = vld [vmem:[%s1655_s5 + $0xb8] sm:$0xff]  ;;  %v994_v43 = vpack.c.bf16 %v96_v37, %v95_v36 }
  0x1d   :  { %989 = vmatpush3.bf16.msra.mxu0 %v988_v22  ;;  %v1024_v39 = vpack.c.bf16 %v191_v35, %v190_v34  ;;  %v79_v42 = vld [vmem:[%s1654_s4 + $0x30] sm:$0xff]  ;;  %v1026_v44 = vpack.c.bf16 %v209_v41, %v208_v40  ;;  %v80_v45 = vld [vmem:[%s1654_s4 + $0x38] sm:$0xff]  ;;  %v97_v48 = vld [vmem:[%s1654_s4 + $0xc0] sm:$0xff]  ;;  %v43_v34 = vlaneseq }
  0x1e   :  { %1021 = vmatpush3.bf16.msra.mxu1 %v1020_v26  ;;  %991 = vmatprep.subr.bf16.mxu0 %v990_v30  ;;  %v192_v46 = vld [vmem:[%s1655_s5 + $0x30] sm:$0xff]  ;;  %v193_v47 = vld [vmem:[%s1655_s5 + $0x38] sm:$0xff]  ;;  %v98_v49 = vld [vmem:[%s1654_s4 + $0xc8] sm:$0xff]  ;;  %v996_v52 = vpack.c.bf16 %v80_v45, %v79_v42 }
  0x1f   :  { %1023 = vmatprep.subr.bf16.mxu1 %v1022_v31  ;;  %v210_v50 = vld [vmem:[%s1655_s5 + $0xc0] sm:$0xff]  ;;  %v211_v51 = vld [vmem:[%s1655_s5 + $0xc8] sm:$0xff]  ;;  %v1028_v53 = vpack.c.bf16 %v193_v47, %v192_v46  ;;  %v998_v56 = vpack.c.bf16 %v98_v49, %v97_v48  ;;  %v99_v60 = vld [vmem:[%s1654_s4 + $0xd0] sm:$0xff]  ;;  %v1514_v35 = vand.u32 127, %v43_v34 }
  0x20   :  { %v81_v54 = vld [vmem:[%s1654_s4 + $0x40] sm:$0xff]  ;;  %v82_v55 = vld [vmem:[%s1654_s4 + $0x48] sm:$0xff]  ;;  %v1030_v57 = vpack.c.bf16 %v211_v51, %v210_v50  ;;  %v100_v61 = vld [vmem:[%s1654_s4 + $0xd8] sm:$0xff] }
  0x21   :  { %993 = vmatpush3.bf16.msra.mxu0 %v992_v38  ;;  %v194_v58 = vld [vmem:[%s1655_s5 + $0x40] sm:$0xff]  ;;  %v195_v59 = vld [vmem:[%s1655_s5 + $0x48] sm:$0xff]  ;;  %v212_v62 = vld [vmem:[%s1655_s5 + $0xd0] sm:$0xff]  ;;  %v1000_v0 = vpack.c.bf16 %v82_v55, %v81_v54  ;;  %v1002_v4 = vpack.c.bf16 %v100_v61, %v99_v60  ;;  %v1517_v36 = vadd.s32 128, %v1514_v35  ;;  %v1256_v38 = vmov 0.0  }
  0x22   :  { %1025 = vmatpush3.bf16.msra.mxu1 %v1024_v39  ;;  %995 = vmatprep.subr.bf16.mxu0 %v994_v43  ;;  %v213_v63 = vld [vmem:[%s1655_s5 + $0xd8] sm:$0xff]  ;;  %v1032_v1 = vpack.c.bf16 %v195_v59, %v194_v58  ;;  %v83_v2 = vld [vmem:[%s1654_s4 + $0x50] sm:$0xff]  ;;  %v101_v8 = vld [vmem:[%s1654_s4 + $0xe0] sm:$0xff] }
  0x23   :  { %1027 = vmatprep.subr.bf16.mxu1 %v1026_v44  ;;  %v84_v3 = vld [vmem:[%s1654_s4 + $0x58] sm:$0xff]  ;;  %v1034_v5 = vpack.c.bf16 %v213_v63, %v212_v62  ;;  %v196_v6 = vld [vmem:[%s1655_s5 + $0x50] sm:$0xff]  ;;  %v102_v9 = vld [vmem:[%s1654_s4 + $0xe8] sm:$0xff] }
  0x24   :  { %v197_v7 = vld [vmem:[%s1655_s5 + $0x58] sm:$0xff]  ;;  %v214_v10 = vld [vmem:[%s1655_s5 + $0xe0] sm:$0xff]  ;;  %v215_v11 = vld [vmem:[%s1655_s5 + $0xe8] sm:$0xff]  ;;  %v1004_v12 = vpack.c.bf16 %v84_v3, %v83_v2  ;;  %v1006_v16 = vpack.c.bf16 %v102_v9, %v101_v8 }
  0x25   :  { %997 = vmatpush3.bf16.msra.mxu0 %v996_v52  ;;  %v1036_v13 = vpack.c.bf16 %v197_v7, %v196_v6  ;;  %v85_v14 = vld [vmem:[%s1654_s4 + $0x60] sm:$0xff]  ;;  %v86_v15 = vld [vmem:[%s1654_s4 + $0x68] sm:$0xff]  ;;  %v1038_v17 = vpack.c.bf16 %v215_v11, %v214_v10  ;;  %v103_v20 = vld [vmem:[%s1654_s4 + $0xf0] sm:$0xff] }
  0x26   :  { %1029 = vmatpush3.bf16.msra.mxu1 %v1028_v53  ;;  %999 = vmatprep.subr.bf16.mxu0 %v998_v56  ;;  %v198_v18 = vld [vmem:[%s1655_s5 + $0x60] sm:$0xff]  ;;  %v199_v19 = vld [vmem:[%s1655_s5 + $0x68] sm:$0xff]  ;;  %v104_v21 = vld [vmem:[%s1654_s4 + $0xf8] sm:$0xff]  ;;  %v1008_v24 = vpack.c.bf16 %v86_v15, %v85_v14  ;;  %v1578_v15 = vshrl.u32 %v43_v34, 7 }
  0x27   :  { %1031 = vmatprep.subr.bf16.mxu1 %v1030_v57  ;;  %v216_v22 = vld [vmem:[%s1655_s5 + $0xf0] sm:$0xff]  ;;  %v217_v23 = vld [vmem:[%s1655_s5 + $0xf8] sm:$0xff]  ;;  %v1040_v25 = vpack.c.bf16 %v199_v19, %v198_v18  ;;  %v1010_v27 = vpack.c.bf16 %v104_v21, %v103_v20  ;;  %v297_v44 = vld [vmem:[%s1652_s2 + $0x8] sm:$0xff] }
  0x28   :  { %v87_v26 = vld [vmem:[%s1654_s4 + $0x70] sm:$0xff]  ;;  %v1042_v28 = vpack.c.bf16 %v217_v23, %v216_v22  ;;  %v88_v29 = vld [vmem:[%s1654_s4 + $0x78] sm:$0xff]  ;;  %v301_v45 = vld [vmem:[%s1652_s2 + $0x28] sm:$0xff]  ;;  %vm484_vm4 = vcmp.lt.s32.totalorder %v1578_v15, 2  ;;  %v320_v19 = vsub.s32 1, %v1578_v15  ;;  %v328_v20 = vsub.s32 3, %v1578_v15 }
  0x29   :  { %1001 = vmatpush3.bf16.msra.mxu0 %v1000_v0  ;;  %v200_v30 = vld [vmem:[%s1655_s5 + $0x70] sm:$0xff]  ;;  %v201_v31 = vld [vmem:[%s1655_s5 + $0x78] sm:$0xff]  ;;  %v1012_v32 = vpack.c.bf16 %v88_v29, %v87_v26  ;;  %v1046_v47 = vpack.c.bf16 %v301_v45, %v297_v44  ;;  %v296_v49 = vld [vmem:[%s1652_s2] sm:$0xff] }
  0x2a   :  { %1033 = vmatpush3.bf16.msra.mxu1 %v1032_v1  ;;  %1003 = vmatprep.subr.bf16.mxu0 %v1002_v4  ;;  %v1044_v33 = vpack.c.bf16 %v201_v31, %v200_v30  ;;  %v299_v46 = vld [vmem:[%s1652_s2 + $0x18] sm:$0xff]  ;;  %v300_v50 = vld [vmem:[%s1652_s2 + $0x20] sm:$0xff]  ;;  %v298_v53 = vld [vmem:[%s1652_s2 + $0x10] sm:$0xff] }
  0x2b   :  { %1035 = vmatprep.subr.bf16.mxu1 %v1034_v5  ;;  %v303_v48 = vld [vmem:[%s1652_s2 + $0x38] sm:$0xff]  ;;  %v1048_v52 = vpack.c.bf16 %v300_v50, %v296_v49  ;;  %v302_v54 = vld [vmem:[%s1652_s2 + $0x30] sm:$0xff]  ;;  %v305_v56 = vld [vmem:[%s1652_s2 + $0x48] sm:$0xff]  ;;  %v1606_v49 = vadd.s32 384, %v1514_v35 }
  0x2c   :  { %v1054_v51 = vpack.c.bf16 %v303_v48, %v299_v46  ;;  %v1056_v55 = vpack.c.bf16 %v302_v54, %v298_v53  ;;  %v309_v57 = vld [vmem:[%s1652_s2 + $0x68] sm:$0xff]  ;;  %v307_v59 = vld [vmem:[%s1652_s2 + $0x58] sm:$0xff]  ;;  %v304_v61 = vld [vmem:[%s1652_s2 + $0x40] sm:$0xff]  ;;  %v1603_v48 = vadd.s32 256, %v1514_v35 }
  0x2d   :  { %1005 = vmatpush3.bf16.msra.mxu0 %v1004_v12  ;;  %v1050_v58 = vpack.c.bf16 %v309_v57, %v305_v56  ;;  %v311_v60 = vld [vmem:[%s1652_s2 + $0x78] sm:$0xff]  ;;  %v308_v63 = vld [vmem:[%s1652_s2 + $0x60] sm:$0xff]  ;;  %v306_v0 = vld [vmem:[%s1652_s2 + $0x50] sm:$0xff] }
  0x2e   :  { %1037 = vmatpush3.bf16.msra.mxu1 %v1036_v13  ;;  %1007 = vmatprep.subr.bf16.mxu0 %v1006_v16  ;;  %v1058_v62 = vpack.c.bf16 %v311_v60, %v307_v59  ;;  %v310_v1 = vld [vmem:[%s1652_s2 + $0x70] sm:$0xff]  ;;  %v1052_v2 = vpack.c.bf16 %v308_v63, %v304_v61  ;;  %v288_v7 = vld [vmem:[%s1651_s1] sm:$0x3]  ;;  %v316_v16 = vsub.s32 0, %v1578_v15  ;;  %vm1588_vm6 = vmxor %vm484_vm4, %vm1257_vm5 }
  0x2f   :  { %1039 = vmatprep.subr.bf16.mxu1 %v1038_v17  ;;  %v1060_v3 = vpack.c.bf16 %v310_v1, %v306_v0  ;;  %v324_v17 = vsub.s32 2, %v1578_v15  ;;  %v312_v18 = vld [vmem:[%s1653_s3] sm:$0xf]  ;;  %vm493_vm7 = vmxor %vm1588_vm6, %vm1257_vm5  ;;  %v556_v0 = vld [vmem:[#allocation3 + $0x8] sm:$0xff] }
  0x30   :  { %v317_v21 = vrot.slane %v312_v18, %v316_v16  ;;  %v558_v1 = vld [vmem:[#allocation3 + $0x18] sm:$0xff] }
  0x31   :  { %1009 = vmatpush3.bf16.msra.mxu0 %v1008_v24  ;;  %v325_v23 = vrot.slane %v312_v18, %v324_v17  ;;  %v321_v24 = vrot.slane %v312_v18, %v320_v19  ;;  %v626_v16 = vld [vmem:[#allocation3 + $0x238] sm:$0xff]  ;;  %v559_v19 = vld [vmem:[#allocation3 + $0x20] sm:$0xff] }
  0x32   :  { %1041 = vmatpush3.bf16.msra.mxu1 %v1040_v25  ;;  %1011 = vmatprep.subr.bf16.mxu0 %v1010_v27  ;;  %v329_v25 = vrot.slane %v312_v18, %v328_v20  ;;  %v561_v20 = vld [vmem:[#allocation3 + $0x30] sm:$0xff] }
  0x33   :  { %1043 = vmatprep.subr.bf16.mxu1 %v1042_v28  ;;  %v1068_v22 = vpack.c.bf16 %v561_v20, %v559_v19 }
  0x35   :  { %1013 = vmatpush3.bf16.msra.mxu0 %v1012_v32 }
  0x36   :  { %1045 = vmatpush3.bf16.msra.mxu1 %v1044_v33  ;;  %1047 = vmatprep.subr.bf16.mxu0 %v1046_v47 }
  0x37   :  { %1055 = vmatprep.subr.bf16.mxu1 %v1054_v51 }
  0x94   :  { %v53_v37 = vpop.permute.xlu0 %52 }
  0x95   :  { %vm54_vm0 = vcmp.eq.s32.totalorder %v1514_v35, %v53_v37  ;;  %vm55_vm1 = vcmp.eq.s32.totalorder %v1517_v36, %v53_v37 }
  0x96   :  { %v894_v39 = vsel %vm54_vm0, 1.0, %v1256_v38  ;;  %v895_v40 = vsel %vm55_vm1, 1.0, %v1256_v38  ;;  %vm854_vm1 = vcmask 3074  }
  0x97   :  { %v62_v41 = vcombine.low %v894_v39, %v895_v40 }
  0x99   :  { %896 = vst.sshfl [vmem:[#allocation2] sm:$0x33 pattern:$0x76325410] %v62_v41 }
  0xa0   :  { %v897_v42 = vld.sshfl [vmem:[#allocation2] sm:$0x33 pattern:$0x76325410] }
  0xa1   :  { %v113_v43 = vcombine.high %v897_v42, %v897_v42 }
  0xa3   :  { %180 = vmatprep.mubr.f32.mxu0 %v113_v43  ;;  %282 = vmatprep.mubr.f32.mxu1 %v113_v43 }
  0xa4   :  { %181 = vmatmul.mubr.f32.vlgmr.msra.gmra.mrb[0].mxu0 %v897_v42  ;;  %283 = vmatmul.mubr.f32.vlgmr.msra.gmra.mrb[0].mxu1 %v897_v42 }
  0xa5   :  { %402 = vmatprep.mubr.f32.mxu0 %v1256_v38  ;;  %473 = vmatprep.mubr.f32.mxu1 %v1256_v38 }
  0xa6   :  { %1049 = vmatpush1.bf16.msra.mxu0 %v1048_v52  ;;  %1057 = vmatpush1.bf16.msra.mxu1 %v1056_v55 }
  0xa7   :  { %1051 = vmatprep.subr.bf16.mxu0 %v1050_v58  ;;  %1059 = vmatprep.subr.bf16.mxu1 %v1058_v62 }
  0xaa   :  { %1053 = vmatpush1.bf16.msra.mxu0 %v1052_v2  ;;  %1061 = vmatpush1.bf16.msra.mxu1 %v1060_v3  ;;  %v620_v2 = vld [vmem:[#allocation3 + $0x208] sm:$0xff]  ;;  %v1062_v3 = vpack.c.bf16 %v558_v1, %v556_v0  ;;  %v637_v1 = vld [vmem:[#allocation3 + $0x290] sm:$0xff] }
  0xac   :  { %1063 = vmatprep.subr.bf16.mxu1 %v1062_v3  ;;  %v578_v3 = vld [vmem:[#allocation3 + $0xb8] sm:$0xff] }
 0x177   :  { %v944_v4 = vpop.f32.mrb[0].mxu0  ;;  %v979_v5 = vpop.f32.mrb[0].mxu1 }
 0x178   :  { %v945_v6 = vpop.f32.mrb[1].mxu0  ;;  %v980_v8 = vpop.f32.mrb[1].mxu1 }
 0x179   :  { %v946_v9 = vadd.f32 %v945_v6, %v944_v4  ;;  %v981_v10 = vadd.f32 %v980_v8, %v979_v5  ;;  %v622_v4 = vld [vmem:[#allocation3 + $0x218] sm:$0xff]  ;;  %v555_v5 = vld [vmem:[#allocation3] sm:$0xff]  ;;  %v557_v6 = vld [vmem:[#allocation3 + $0x10] sm:$0xff] }
 0x17a   :  { %v1064_v8 = vpack.c.bf16 %v557_v6, %v555_v5  ;;  %v642_v5 = vld [vmem:[#allocation3 + $0x2b8] sm:$0xff] }
 0x17b   :  { %v290_v11 = vadd.f32 %v981_v10, %v288_v7  ;;  %v289_v12 = vadd.f32 %v946_v9, %v288_v7  ;;  %v1126_v7 = vpack.c.bf16 %v622_v4, %v620_v2  ;;  %v619_v9 = vld [vmem:[#allocation3 + $0x200] sm:$0xff]  ;;  %v621_v10 = vld [vmem:[#allocation3 + $0x210] sm:$0xff]  ;;  %v576_v2 = vld [vmem:[#allocation3 + $0xa8] sm:$0xff] }
 0x17c   :  { %v640_v4 = vld [vmem:[#allocation3 + $0x2a8] sm:$0xff] }
 0x17d   :  { %v292_v13 = vrot.slane %v290_v11, 6  ;;  %v560_v11 = vld [vmem:[#allocation3 + $0x28] sm:$0xff]  ;;  %1127 = vmatprep.subr.bf16.mxu0 %v1126_v7 }
 0x17f   :  { %v295_v14 = vsel %vm294_vm2, %v289_v12, %v292_v13  ;;  %v1128_v12 = vpack.c.bf16 %v621_v10, %v619_v9  ;;  %v562_v13 = vld [vmem:[#allocation3 + $0x38] sm:$0xff]  ;;  %v575_v9 = vld [vmem:[#allocation3 + $0xa0] sm:$0xff]  ;;  %v577_v10 = vld [vmem:[#allocation3 + $0xb0] sm:$0xff] }
 0x180   :  { %898 = vmatmul.mubr.msk.f32.vlgmr.msra.gmra.mrb[2].mxu0 %vm334_vm3, %v295_v14  ;;  %899 = vmatmul.mubr.msk.f32.vlgmr.msra.gmra.mrb[2].mxu1 %vm334_vm3, %v295_v14  ;;  %v624_v14 = vld [vmem:[#allocation3 + $0x228] sm:$0xff]  ;;  %v1066_v17 = vpack.c.bf16 %v562_v13, %v560_v11  ;;  %v639_v11 = vld [vmem:[#allocation3 + $0x2a0] sm:$0xff]  ;;  %v641_v13 = vld [vmem:[#allocation3 + $0x2b0] sm:$0xff]  ;;  %v1084_v19 = vpack.c.bf16 %v577_v10, %v575_v9 }
 0x181   :  { %1065 = vmatpush1.bf16.msra.mxu1 %v1064_v8  ;;  %v1130_v18 = vpack.c.bf16 %v626_v16, %v624_v14  ;;  %1129 = vmatpush1.bf16.msra.mxu0 %v1128_v12  ;;  %v1082_v8 = vpack.c.bf16 %v578_v3, %v576_v2  ;;  %v1146_v12 = vpack.c.bf16 %v642_v5, %v640_v4  ;;  %v580_v14 = vld [vmem:[#allocation3 + $0xc8] sm:$0xff]  ;;  %v582_v16 = vld [vmem:[#allocation3 + $0xd8] sm:$0xff]  ;;  %v593_v2 = vld [vmem:[#allocation3 + $0x130] sm:$0xff] }
 0x182   :  { %1067 = vmatprep.subr.bf16.mxu1 %v1066_v17  ;;  %v644_v17 = vld [vmem:[#allocation3 + $0x2c8] sm:$0xff]  ;;  %v1148_v20 = vpack.c.bf16 %v641_v13, %v639_v11  ;;  %v655_v3 = vld [vmem:[#allocation3 + $0x320] sm:$0xff]  ;;  %v657_v5 = vld [vmem:[#allocation3 + $0x330] sm:$0xff] }
 0x183   :  { %1131 = vmatprep.subr.bf16.mxu0 %v1130_v18  ;;  %v646_v18 = vld [vmem:[#allocation3 + $0x2d8] sm:$0xff]  ;;  %v1164_v11 = vpack.c.bf16 %v657_v5, %v655_v3  ;;  %v595_v13 = vld [vmem:[#allocation3 + $0x140] sm:$0xff] }
 0x184   :  { %v662_v9 = vld [vmem:[#allocation3 + $0x358] sm:$0xff]  ;;  %v611_v5 = vld [vmem:[#allocation3 + $0x1c0] sm:$0xff] }
 0x185   :  { %1069 = vmatpush1.bf16.msra.mxu1 %v1068_v22  ;;  %v579_v22 = vld [vmem:[#allocation3 + $0xc0] sm:$0xff] }
 0x253   :  { %v404_v26 = vpop.f32.mrb[2].mxu0  ;;  %v475_v27 = vpop.f32.mrb[2].mxu1 }
 0x254   :  { %v405_v28 = vadd.f32 %v404_v26, %v317_v21  ;;  %v476_v29 = vadd.f32 %v475_v27, %v325_v23  ;;  %v406_v30 = vpop.f32.mrb[3].mxu0  ;;  %v477_v31 = vpop.f32.mrb[3].mxu1  ;;  %v623_v21 = vld [vmem:[#allocation3 + $0x220] sm:$0xff]  ;;  %v625_v23 = vld [vmem:[#allocation3 + $0x230] sm:$0xff] }
 0x255   :  { %v407_v32 = vadd.f32 %v406_v30, %v321_v24  ;;  %v478_v33 = vadd.f32 %v477_v31, %v329_v25  ;;  %v564_v24 = vld [vmem:[#allocation3 + $0x48] sm:$0xff]  ;;  %v566_v25 = vld [vmem:[#allocation3 + $0x58] sm:$0xff]  ;;  %v1132_v26 = vpack.c.bf16 %v625_v23, %v623_v21  ;;  %v563_v30 = vld [vmem:[#allocation3 + $0x40] sm:$0xff]  ;;  %v1086_v21 = vpack.c.bf16 %v582_v16, %v580_v14 }
 0x256   :  { %v497_v34 = vsel %vm493_vm7, %v405_v28, -3.4028235e+38  ;;  %v499_v37 = vsel %vm1588_vm6, %v476_v29, -3.4028235e+38  ;;  %v1070_v27 = vpack.c.bf16 %v566_v25, %v564_v24  ;;  %v628_v28 = vld [vmem:[#allocation3 + $0x248] sm:$0xff]  ;;  %v630_v29 = vld [vmem:[#allocation3 + $0x258] sm:$0xff]  ;;  %v1150_v25 = vpack.c.bf16 %v646_v18, %v644_v17 }
 0x257   :  { %v502_v39 = vsel %vm501_vm8, %v497_v34, -inf  ;;  %v504_v40 = vsel %vm501_vm8, %v499_v37, -inf  ;;  %v498_v41 = vsel %vm493_vm7, %v407_v32, -3.4028235e+38  ;;  %v500_v42 = vsel %vm1588_vm6, %v478_v33, -3.4028235e+38  ;;  %1133 = vmatpush1.bf16.msra.mxu0 %v1132_v26 }
 0x258   :  { %v503_v43 = vsel %vm501_vm8, %v498_v41, -inf  ;;  %v505_v44 = vsel %vm501_vm8, %v500_v42, -inf  ;;  %v1134_v31 = vpack.c.bf16 %v630_v29, %v628_v28  ;;  %v565_v32 = vld [vmem:[#allocation3 + $0x50] sm:$0xff]  ;;  %v627_v33 = vld [vmem:[#allocation3 + $0x240] sm:$0xff]  ;;  %1071 = vmatprep.subr.bf16.mxu1 %v1070_v27  ;;  %v584_v27 = vld [vmem:[#allocation3 + $0xe8] sm:$0xff] }
 0x259   :  { %v506_v45 = vmax.f32 %v502_v39, %v503_v43  ;;  %v507_v46 = vmax.f32 %v504_v40, %v505_v44  ;;  %v568_v39 = vld [vmem:[#allocation3 + $0x68] sm:$0xff]  ;;  %v570_v40 = vld [vmem:[#allocation3 + $0x78] sm:$0xff]  ;;  %v581_v23 = vld [vmem:[#allocation3 + $0xd0] sm:$0xff] }
 0x25a   :  { %v1074_v43 = vpack.c.bf16 %v570_v40, %v568_v39  ;;  %v634_v44 = vld [vmem:[#allocation3 + $0x278] sm:$0xff]  ;;  %1135 = vmatprep.subr.bf16.mxu0 %v1134_v31  ;;  %v643_v24 = vld [vmem:[#allocation3 + $0x2c0] sm:$0xff]  ;;  %v645_v26 = vld [vmem:[#allocation3 + $0x2d0] sm:$0xff]  ;;  %v1088_v31 = vpack.c.bf16 %v581_v23, %v579_v22 }
 0x25b   :  { %v508_v47 = vmax.f32 %v506_v45, %v507_v46  ;;  %v567_v45 = vld [vmem:[#allocation3 + $0x60] sm:$0xff]  ;;  %v569_v46 = vld [vmem:[#allocation3 + $0x70] sm:$0xff]  ;;  %v586_v28 = vld [vmem:[#allocation3 + $0xf8] sm:$0xff] }
 0x25c   :  { %v648_v29 = vld [vmem:[#allocation3 + $0x2e8] sm:$0xff]  ;;  %v647_v39 = vld [vmem:[#allocation3 + $0x2e0] sm:$0xff]  ;;  %v597_v14 = vld [vmem:[#allocation3 + $0x150] sm:$0xff] }
 0x25d   :  { %509 = vmax.xlane.f32.xlu0 %v508_v47  ;;  %v659_v16 = vld [vmem:[#allocation3 + $0x340] sm:$0xff]  ;;  %v661_v18 = vld [vmem:[#allocation3 + $0x350] sm:$0xff]  ;;  %v666_v22 = vld [vmem:[#allocation3 + $0x378] sm:$0xff]  ;;  %v1104_v23 = vpack.c.bf16 %v597_v14, %v595_v13 }
 0x2ea   :  { %v510_v50 = vpop.xlane.xlu0 %509 }
 0x2eb   :  { %vm511_vm9 = vcmp.eq.f32.partialorder %v497_v34, %v510_v50  ;;  %vm512_vm10 = vcmp.eq.f32.partialorder %v498_v41, %v510_v50  ;;  %vm513_vm11 = vcmp.eq.f32.partialorder %v499_v37, %v510_v50  ;;  %vm514_vm12 = vcmp.eq.f32.partialorder %v500_v42, %v510_v50  ;;  %v629_v34 = vld [vmem:[#allocation3 + $0x250] sm:$0xff]  ;;  %v632_v41 = vld [vmem:[#allocation3 + $0x268] sm:$0xff]  ;;  %v631_v50 = vld [vmem:[#allocation3 + $0x260] sm:$0xff] }
 0x2ec   :  { %v515_v51 = vsel %vm511_vm9, %v1514_v35, 512  ;;  %v516_v52 = vsel %vm512_vm10, %v1517_v36, 512  ;;  %v517_v53 = vsel %vm513_vm11, %v1603_v48, 512  ;;  %v518_v54 = vsel %vm514_vm12, %v1606_v49, 512 }
 0x2ed   :  { %v519_v55 = vsel %vm501_vm8, %v515_v51, 2147483647  ;;  %v520_v56 = vsel %vm501_vm8, %v516_v52, 2147483647  ;;  %v521_v57 = vsel %vm501_vm8, %v517_v53, 2147483647  ;;  %v1072_v37 = vpack.c.bf16 %v565_v32, %v563_v30 }
 0x2ee   :  { %v522_v58 = vsel %vm501_vm8, %v518_v54, 2147483647  ;;  %vm523_vm13 = vcmp.lt.s32.totalorder %v519_v55, %v520_v56  ;;  %v1136_v42 = vpack.c.bf16 %v629_v34, %v627_v33  ;;  %v1138_v47 = vpack.c.bf16 %v634_v44, %v632_v41  ;;  %v633_v51 = vld [vmem:[#allocation3 + $0x270] sm:$0xff]  ;;  %v572_v52 = vld [vmem:[#allocation3 + $0x88] sm:$0xff]  ;;  %v574_v53 = vld [vmem:[#allocation3 + $0x98] sm:$0xff] }
 0x2ef   :  { %vm525_vm14 = vcmp.lt.s32.totalorder %v521_v57, %v522_v58  ;;  %v524_v59 = vsel %vm523_vm13, %v519_v55, %v520_v56  ;;  %v636_v54 = vld [vmem:[#allocation3 + $0x288] sm:$0xff]  ;;  %v638_v55 = vld [vmem:[#allocation3 + $0x298] sm:$0xff]  ;;  %1073 = vmatpush1.bf16.msra.mxu1 %v1072_v37  ;;  %v1076_v56 = vpack.c.bf16 %v569_v46, %v567_v45  ;;  %v1152_v32 = vpack.c.bf16 %v645_v26, %v643_v24  ;;  %v583_v34 = vld [vmem:[#allocation3 + $0xe0] sm:$0xff] }
 0x2f0   :  { %v526_v60 = vsel %vm525_vm14, %v521_v57, %v522_v58  ;;  %1137 = vmatpush1.bf16.msra.mxu0 %v1136_v42  ;;  %1075 = vmatprep.subr.bf16.mxu1 %v1074_v43  ;;  %v1140_v57 = vpack.c.bf16 %v633_v51, %v631_v50  ;;  %v1078_v58 = vpack.c.bf16 %v574_v53, %v572_v52  ;;  %v650_v30 = vld [vmem:[#allocation3 + $0x2f8] sm:$0xff]  ;;  %v585_v37 = vld [vmem:[#allocation3 + $0xf0] sm:$0xff]  ;;  %v588_v42 = vld [vmem:[#allocation3 + $0x108] sm:$0xff] }
 0x2f1   :  { %vm527_vm15 = vcmp.lt.s32.totalorder %v524_v59, %v526_v60  ;;  %1139 = vmatprep.subr.bf16.mxu0 %v1138_v47  ;;  %v1142_v0 = vpack.c.bf16 %v638_v55, %v636_v54  ;;  %v1090_v33 = vpack.c.bf16 %v586_v28, %v584_v27  ;;  %v1154_v40 = vpack.c.bf16 %v650_v30, %v648_v29  ;;  %v649_v41 = vld [vmem:[#allocation3 + $0x2f0] sm:$0xff]  ;;  %v590_v43 = vld [vmem:[#allocation3 + $0x118] sm:$0xff]  ;;  %v652_v44 = vld [vmem:[#allocation3 + $0x308] sm:$0xff] }
 0x2f2   :  { %v1616_v61 = vsel %vm527_vm15, %v524_v59, %v526_v60  ;;  %v571_v59 = vld [vmem:[#allocation3 + $0x80] sm:$0xff]  ;;  %v573_v60 = vld [vmem:[#allocation3 + $0x90] sm:$0xff]  ;;  %v654_v45 = vld [vmem:[#allocation3 + $0x318] sm:$0xff]  ;;  %v1092_v46 = vpack.c.bf16 %v585_v37, %v583_v34  ;;  %v1156_v47 = vpack.c.bf16 %v649_v41, %v647_v39  ;;  %v1094_v50 = vpack.c.bf16 %v590_v43, %v588_v42 }
 0x2f3   :  { %v530_v62 = vshra.s32 %v1616_v61, 16  ;;  %1077 = vmatpush1.bf16.msra.mxu1 %v1076_v56  ;;  %v1080_v6 = vpack.c.bf16 %v573_v60, %v571_v59  ;;  %v587_v51 = vld [vmem:[#allocation3 + $0x100] sm:$0xff]  ;;  %v589_v52 = vld [vmem:[#allocation3 + $0x110] sm:$0xff]  ;;  %v1158_v54 = vpack.c.bf16 %v654_v45, %v652_v44  ;;  %v592_v56 = vld [vmem:[#allocation3 + $0x128] sm:$0xff]  ;;  %v1168_v24 = vpack.c.bf16 %v661_v18, %v659_v16 }
 0x2f4   :  { %1141 = vmatpush1.bf16.msra.mxu0 %v1140_v57  ;;  %1079 = vmatprep.subr.bf16.mxu1 %v1078_v58  ;;  %v651_v53 = vld [vmem:[#allocation3 + $0x300] sm:$0xff]  ;;  %v653_v55 = vld [vmem:[#allocation3 + $0x310] sm:$0xff]  ;;  %v594_v57 = vld [vmem:[#allocation3 + $0x138] sm:$0xff]  ;;  %v1096_v60 = vpack.c.bf16 %v589_v52, %v587_v51 }
 0x2f5   :  { %v1619_v63 = vcvt.s32.f32 %v530_v62  ;;  %v635_v62 = vld [vmem:[#allocation3 + $0x280] sm:$0xff]  ;;  %1143 = vmatprep.subr.bf16.mxu0 %v1142_v0  ;;  %v656_v58 = vld [vmem:[#allocation3 + $0x328] sm:$0xff]  ;;  %v658_v59 = vld [vmem:[#allocation3 + $0x338] sm:$0xff]  ;;  %v1098_v0 = vpack.c.bf16 %v594_v57, %v592_v56 }
 0x2f6   :  { %v1144_v7 = vpack.c.bf16 %v637_v1, %v635_v62  ;;  %v1160_v62 = vpack.c.bf16 %v653_v55, %v651_v53  ;;  %v591_v1 = vld [vmem:[#allocation3 + $0x120] sm:$0xff]  ;;  %v1162_v4 = vpack.c.bf16 %v658_v59, %v656_v58  ;;  %v601_v27 = vld [vmem:[#allocation3 + $0x170] sm:$0xff]  ;;  %v670_v34 = vld [vmem:[#allocation3 + $0x398] sm:$0xff] }
 0x2f7   :  { %533 = vmin.xlane.f32.xlu1 %v1619_v63  ;;  %1081 = vmatpush1.bf16.msra.mxu1 %v1080_v6  ;;  %v596_v6 = vld [vmem:[#allocation3 + $0x148] sm:$0xff]  ;;  %v1100_v10 = vpack.c.bf16 %v593_v2, %v591_v1  ;;  %v599_v26 = vld [vmem:[#allocation3 + $0x160] sm:$0xff]  ;;  %v665_v30 = vld [vmem:[#allocation3 + $0x370] sm:$0xff] }
 0x2f8   :  { %1145 = vmatpush1.bf16.msra.mxu0 %v1144_v7  ;;  %1083 = vmatprep.subr.bf16.mxu1 %v1082_v8  ;;  %v598_v7 = vld [vmem:[#allocation3 + $0x158] sm:$0xff]  ;;  %v660_v8 = vld [vmem:[#allocation3 + $0x348] sm:$0xff]  ;;  %v663_v28 = vld [vmem:[#allocation3 + $0x360] sm:$0xff]  ;;  %v1108_v37 = vpack.c.bf16 %v601_v27, %v599_v26 }
 0x2f9   :  { %1147 = vmatprep.subr.bf16.mxu0 %v1146_v12  ;;  %v1102_v12 = vpack.c.bf16 %v598_v7, %v596_v6  ;;  %v1166_v17 = vpack.c.bf16 %v662_v9, %v660_v8  ;;  %v1172_v39 = vpack.c.bf16 %v665_v30, %v663_v28  ;;  %v603_v41 = vld [vmem:[#allocation3 + $0x180] sm:$0xff]  ;;  %v605_v42 = vld [vmem:[#allocation3 + $0x190] sm:$0xff]  ;;  %v674_v51 = vld [vmem:[#allocation3 + $0x3b8] sm:$0xff] }
 0x2fa   :  { %v667_v43 = vld [vmem:[#allocation3 + $0x380] sm:$0xff]  ;;  %v669_v45 = vld [vmem:[#allocation3 + $0x390] sm:$0xff]  ;;  %v1112_v52 = vpack.c.bf16 %v605_v42, %v603_v41  ;;  %v678_v1 = vld [vmem:[#allocation3 + $0x3d8] sm:$0xff] }
 0x2fb   :  { %1085 = vmatpush1.bf16.msra.mxu1 %v1084_v19  ;;  %v600_v19 = vld [vmem:[#allocation3 + $0x168] sm:$0xff]  ;;  %v1176_v53 = vpack.c.bf16 %v669_v45, %v667_v43  ;;  %v607_v55 = vld [vmem:[#allocation3 + $0x1a0] sm:$0xff]  ;;  %v609_v56 = vld [vmem:[#allocation3 + $0x1b0] sm:$0xff] }
 0x2fc   :  { %1149 = vmatpush1.bf16.msra.mxu0 %v1148_v20  ;;  %1087 = vmatprep.subr.bf16.mxu1 %v1086_v21  ;;  %v602_v20 = vld [vmem:[#allocation3 + $0x178] sm:$0xff]  ;;  %v664_v21 = vld [vmem:[#allocation3 + $0x368] sm:$0xff]  ;;  %v671_v57 = vld [vmem:[#allocation3 + $0x3a0] sm:$0xff]  ;;  %v1116_v2 = vpack.c.bf16 %v609_v56, %v607_v55 }
 0x2fd   :  { %1151 = vmatprep.subr.bf16.mxu0 %v1150_v25  ;;  %v1106_v25 = vpack.c.bf16 %v602_v20, %v600_v19  ;;  %v1170_v29 = vpack.c.bf16 %v666_v22, %v664_v21  ;;  %v673_v59 = vld [vmem:[#allocation3 + $0x3b0] sm:$0xff]  ;;  %v675_v8 = vld [vmem:[#allocation3 + $0x3c0] sm:$0xff]  ;;  %v618_v18 = vld [vmem:[#allocation3 + $0x1f8] sm:$0xff] }
 0x2fe   :  { %v1180_v3 = vpack.c.bf16 %v673_v59, %v671_v57  ;;  %v613_v6 = vld [vmem:[#allocation3 + $0x1d0] sm:$0xff]  ;;  %v680_v19 = vld [vmem:[#allocation3 + $0x3e8] sm:$0xff]  ;;  %v682_v21 = vld [vmem:[#allocation3 + $0x3f8] sm:$0xff] }
 0x2ff   :  { %1089 = vmatpush1.bf16.msra.mxu1 %v1088_v31  ;;  %v604_v31 = vld [vmem:[#allocation3 + $0x188] sm:$0xff]  ;;  %v677_v9 = vld [vmem:[#allocation3 + $0x3d0] sm:$0xff]  ;;  %v615_v22 = vld [vmem:[#allocation3 + $0x1e0] sm:$0xff] }
 0x300   :  { %1153 = vmatpush1.bf16.msra.mxu0 %v1152_v32  ;;  %1091 = vmatprep.subr.bf16.mxu1 %v1090_v33  ;;  %v606_v32 = vld [vmem:[#allocation3 + $0x198] sm:$0xff]  ;;  %v668_v33 = vld [vmem:[#allocation3 + $0x388] sm:$0xff]  ;;  %v679_v26 = vld [vmem:[#allocation3 + $0x3e0] sm:$0xff] }
 0x301   :  { %1155 = vmatprep.subr.bf16.mxu0 %v1154_v40  ;;  %v1110_v40 = vpack.c.bf16 %v606_v32, %v604_v31  ;;  %v1174_v44 = vpack.c.bf16 %v670_v34, %v668_v33  ;;  %v681_v27 = vld [vmem:[#allocation3 + $0x3f0] sm:$0xff] }
 0x302   :  { %v1188_v28 = vpack.c.bf16 %v681_v27, %v679_v26 }
 0x303   :  { %1093 = vmatpush1.bf16.msra.mxu1 %v1092_v46  ;;  %v608_v46 = vld [vmem:[#allocation3 + $0x1a8] sm:$0xff] }
 0x304   :  { %1157 = vmatpush1.bf16.msra.mxu0 %v1156_v47  ;;  %1095 = vmatprep.subr.bf16.mxu1 %v1094_v50  ;;  %v610_v47 = vld [vmem:[#allocation3 + $0x1b8] sm:$0xff]  ;;  %v672_v50 = vld [vmem:[#allocation3 + $0x3a8] sm:$0xff] }
 0x305   :  { %1159 = vmatprep.subr.bf16.mxu0 %v1158_v54  ;;  %v1114_v54 = vpack.c.bf16 %v610_v47, %v608_v46  ;;  %v1178_v58 = vpack.c.bf16 %v674_v51, %v672_v50 }
 0x307   :  { %1097 = vmatpush1.bf16.msra.mxu1 %v1096_v60  ;;  %v612_v60 = vld [vmem:[#allocation3 + $0x1c8] sm:$0xff] }
 0x308   :  { %1161 = vmatpush1.bf16.msra.mxu0 %v1160_v62  ;;  %1099 = vmatprep.subr.bf16.mxu1 %v1098_v0  ;;  %v614_v62 = vld [vmem:[#allocation3 + $0x1d8] sm:$0xff]  ;;  %v676_v0 = vld [vmem:[#allocation3 + $0x3c8] sm:$0xff] }
 0x309   :  { %1163 = vmatprep.subr.bf16.mxu0 %v1162_v4  ;;  %v1118_v4 = vpack.c.bf16 %v614_v62, %v612_v60  ;;  %v1182_v7 = vpack.c.bf16 %v678_v1, %v676_v0 }
 0x30b   :  { %1101 = vmatpush1.bf16.msra.mxu1 %v1100_v10  ;;  %v1120_v10 = vpack.c.bf16 %v613_v6, %v611_v5 }
 0x30c   :  { %1165 = vmatpush1.bf16.msra.mxu0 %v1164_v11  ;;  %1103 = vmatprep.subr.bf16.mxu1 %v1102_v12  ;;  %v1184_v11 = vpack.c.bf16 %v677_v9, %v675_v8  ;;  %v529_v12 = vand.u32 65535, %v1616_v61 }
 0x30d   :  { %1167 = vmatprep.subr.bf16.mxu0 %v1166_v17  ;;  %v616_v17 = vld [vmem:[#allocation3 + $0x1e8] sm:$0xff] }
 0x30e   :  { %v531_v14 = vcvt.s32.f32 %v529_v12  ;;  %v1122_v20 = vpack.c.bf16 %v618_v18, %v616_v17 }
 0x30f   :  { %1105 = vmatpush1.bf16.msra.mxu1 %v1104_v23  ;;  %v617_v23 = vld [vmem:[#allocation3 + $0x1f0] sm:$0xff] }
 0x310   :  { %1169 = vmatpush1.bf16.msra.mxu0 %v1168_v24  ;;  %1107 = vmatprep.subr.bf16.mxu1 %v1106_v25  ;;  %v1186_v24 = vpack.c.bf16 %v682_v21, %v680_v19  ;;  %v1124_v25 = vpack.c.bf16 %v617_v23, %v615_v22 }
 0x311   :  { %1171 = vmatprep.subr.bf16.mxu0 %v1170_v29 }
 0x313   :  { %1109 = vmatpush1.bf16.msra.mxu1 %v1108_v37 }
 0x314   :  { %1173 = vmatpush1.bf16.msra.mxu0 %v1172_v39  ;;  %1111 = vmatprep.subr.bf16.mxu1 %v1110_v40  ;;  %v1259_v39 = vmov 1.0  }
 0x315   :  { %1175 = vmatprep.subr.bf16.mxu0 %v1174_v44 }
 0x317   :  { %1113 = vmatpush1.bf16.msra.mxu1 %v1112_v52 }
 0x318   :  { %1177 = vmatpush1.bf16.msra.mxu0 %v1176_v53  ;;  %1115 = vmatprep.subr.bf16.mxu1 %v1114_v54 }
 0x319   :  { %1179 = vmatprep.subr.bf16.mxu0 %v1178_v58 }
 0x31b   :  { %1117 = vmatpush1.bf16.msra.mxu1 %v1116_v2 }
 0x31c   :  { %1181 = vmatpush1.bf16.msra.mxu0 %v1180_v3  ;;  %1119 = vmatprep.subr.bf16.mxu1 %v1118_v4 }
 0x31d   :  { %1183 = vmatprep.subr.bf16.mxu0 %v1182_v7 }
 0x31f   :  { %1121 = vmatpush1.bf16.msra.mxu1 %v1120_v10 }
 0x320   :  { %1185 = vmatpush1.bf16.msra.mxu0 %v1184_v11  ;;  %1123 = vmatprep.subr.bf16.mxu1 %v1122_v20 }
 0x321   :  { %1187 = vmatprep.subr.bf16.mxu0 %v1186_v24 }
 0x323   :  { %1125 = vmatpush1.bf16.msra.mxu1 %v1124_v25 }
 0x324   :  { %1189 = vmatpush1.bf16.msra.mxu0 %v1188_v28 }
 0x384   :  { %v534_v13 = vpop.xlane.xlu1 %533 }
 0x385   :  { %vm535_vm0 = vcmp.eq.f32.partialorder %v1619_v63, %v534_v13  ;;  %v540_v61 = vcvt.f32.s32 %v534_v13  ;;  %v1258_v63 = vmov 1983009808  }
 0x386   :  { %v536_v16 = vsel %vm535_vm0, %v531_v14, inf  ;;  %v866_v29 = vunpack.c.l.s4 %v1258_v63 }
 0x387   :  { %537 = vmin.xlane.f32.xlu1 %v536_v16  ;;  %v541_v31 = vshll.u32 %v540_v61, 16 }
 0x388   :  { %v867_v33 = vunpack.c.0.s8 %v866_v29 }
 0x38a   :  { %v870_v40 = vsub.s32 %v867_v33, %v1578_v15 }
 0x414   :  { %v538_v30 = vpop.xlane.xlu1 %537 }
 0x415   :  { %v539_v32 = vcvt.f32.s32 %v538_v30 }
 0x417   :  { %v542_v34 = vadd.s32 %v541_v31, %v539_v32 }
 0x419   :  { %v909_v37 = vadd.s32 4294967040, %v542_v34  ;;  %vm544_vm3 = vcmp.eq.s32.totalorder %v1517_v36, %v542_v34  ;;  %vm546_vm4 = vcmp.eq.s32.totalorder %v1606_v49, %v542_v34  ;;  %vm543_vm5 = vcmp.eq.s32.totalorder %v1514_v35, %v542_v34 }
 0x41a   :  { %904 = vmatprep.mubr.msk.f32.mxu1 %vm544_vm3, %v1259_v39  ;;  %906 = vmatprep.mubr.msk.f32.mxu0 %vm546_vm4, %v1259_v39  ;;  %vm545_vm6 = vcmp.eq.s32.totalorder %v1603_v48, %v542_v34 }
 0x41b   :  { %855 = vst.msk [vmem:[%s1657_s7 - $0x2] sm:$0xc] %vm854_vm1, %v909_v37  ;;  %vm856_vm7 = vcmp.eq.s32.totalorder %v1514_v35, %v909_v37  ;;  %vm857_vm8 = vcmp.eq.s32.totalorder %v1517_v36, %v909_v37  ;;  %905 = vmatmul.mubr.msk.f32.vlgmr.msra.gmra.mrb[4].mxu1 %vm543_vm5, %v1259_v39  ;;  %907 = vmatmul.mubr.msk.f32.vlgmr.msra.gmra.mrb[4].mxu0 %vm545_vm6, %v1259_v39  ;;  %s1260_s7 = smov [#allocation6]  }
 0x41c   :  { %v910_v49 = vsel %vm856_vm7, 1.0, %v1256_v38  ;;  %v911_v41 = vsel %vm857_vm8, 1.0, %v1256_v38  ;;  %s883_s12 = sshll.u32 %s1260_s7, 4  ;;  %s884_s12 = int_to_ptr.vmem [resolvable:$true] %s883_s12 }
 0x41d   :  { %v864_v42 = vcombine.low %v910_v49, %v911_v41  ;;  %s1226_s13 = scalar_lea.vmem %s884_s12, 64  ;;  %p1231_p9 = scmp.lt.s32.totalorder %s884_s12, %s884_s12 }
 0x41e   :  { %p1227_p8 = scmp.ne.s32.totalorder %s884_s12, %s1226_s13  ;;  %p1232_p10 = scmp.lt.s32.totalorder %s1226_s13, %s1226_s13 }
 0x41f   :  { %v871_v43 = vrot.slane %v864_v42, %v870_v40 }
 0x420   :  { %p1233_p11 = por %p1232_p10, %p1231_p9 }
 0x421   :  { %v872_v44 = vcombine.high %v871_v43, %v871_v43 }
 0x422   :  { %p1234_p12 = pnand %p1233_p11, %p1227_p8 }
 0x423   :  { %874 = vst [vmem:[#allocation2] sm:$0xf] %v872_v44 }
 0x4ee   :  { %v749_v48 = vpop.f32.mrb[4].mxu1  ;;  %v820_v15 = vpop.f32.mrb[4].mxu0 }
 0x4ef   :  { %v821_v45 = vadd.f32 %v820_v15, %v749_v48  ;;  %v751_v46 = vpop.f32.mrb[5].mxu1  ;;  %v822_v47 = vpop.f32.mrb[5].mxu0 }
 0x4f0   :  { %v823_v50 = vadd.f32 %v822_v47, %v751_v46 }
 0x4f1   :  { %v827_v51 = vrot.slane %v821_v45, 2 }
 0x4f2   :  { %v828_v35 = vrot.slane %v823_v50, 2 }
 0x4f3   :  { %v831_v52 = vmul.f32 %v827_v51, %v821_v45 }
 0x4f4   :  { %v832_v36 = vmul.f32 %v828_v35, %v823_v50 }
 0x4f5   :  { %v833_v53 = vsel %vm294_vm2, %v831_v52, 0.0 }
 0x4f6   :  { %v834_v54 = vsel %vm294_vm2, %v832_v36, 0.0 }
 0x4f7   :  { %v835_v55 = vadd.f32 %v834_v54, %v833_v53 }
 0x4f9   :  { %836 = vadd.xlane.f32.xlu1 %v835_v55 }
 0x586   :  { %v837_v38 = vpop.xlane.xlu1 %836 }
 0x587   :  { %1202 = vrcp.f32 %v837_v38 }
 0x591   :  { %v1203_v56 = vpop.eup %1202 }
 0x592   :  { %v839_v57 = vmul.f32 %v1203_v56, %v831_v52  ;;  %v840_v58 = vmul.f32 %v1203_v56, %v832_v36 }
 0x594   :  { %v843_v59 = vcombine.low %v839_v57, %v840_v58 }
 0x596   :  { %908 = vst.sshfl [vmem:[#allocation6] sm:$0x33 pattern:$0x76325410] %v843_v59 }
 0x597   :  { %1237 = shalt.err (!%p1234_p12)
}
 0x598   :  { %s1238_s16 = scalar_lea.hbm %s1658_s8, 64 }
 0x599   :  { %p1239_p13 = scmp.ne.s32.totalorder %s1658_s8, %s1238_s16  ;;  %p1242_p0 = scmp.lt.u32.totalorder %s1238_s16, %s1658_s8 }
 0x59b   :  { %p1244_p1 = pnand %p1242_p0, %p1239_p13 }
 0x59d   :  { %1247 = shalt.err (!%p1244_p1)
}
 0x59e   :  { %886 = dma.vmem_to_hbm [thread:$0]  %s884_s12, 64, %s1658_s8, [#allocation5]  }
 0x59f   :  { %1250 = dma.done.wait [#allocation5], 64  }
 0x5a0   :  { %1251 = vsyncadd [#allocation5], 4294967232 }
 0x5a1   :  { %892 = vsyncpa [#allocation4], 1 }
 0x5a2   :  { %893 = vsyncpa [#allocation5], 1 }

</bundles_post_ra>
